<compile_context>
chip_gen: v7x
topology: tpu7x:2x2x1
jax: 0.10.0
libtpu: 0.0.40
codegen_flags: <defaults>
</compile_context>

<pallas_src>
import functools

import jax
import jax.numpy as jnp
from jax import lax
from jax.experimental import pallas as pl
from jax.experimental.pallas import tpu as pltpu


# ---------------------------------------------------------------------------
# Fast path kernel: Lq == Lk == 1.  Output == v exactly, so the minimal
# correct kernel is one HBM -> HBM DMA (no VMEM hop, halves DMA bytes).
# ---------------------------------------------------------------------------
def _hbm_copy_kernel(v_hbm_ref, o_hbm_ref, sem):
    cp = pltpu.make_async_copy(v_hbm_ref, o_hbm_ref, sem)
    cp.start()
    cp.wait()


# ---------------------------------------------------------------------------
# General fused path (validation / non-module shapes): whole problem as one
# ungridded VMEM-resident block.
# ---------------------------------------------------------------------------
def _sdpa_fused_kernel(q_ref, k_ref, v_ref, o_ref, *, scale):
    # Fold 1/scale_factor into q (smaller than the (B,Lq,Lk) score tensor).
    q = q_ref[...].astype(jnp.float32) * scale    # (B, Lq, D)
    k = k_ref[...].astype(jnp.float32)            # (B, Lk, D)
    v = v_ref[...].astype(jnp.float32)            # (B, Lk, Dv)
    Lq = q.shape[1]

    if Lq == 1:
        # Degenerate (1 x D) @ (D x Lk) per batch wastes the MXU; keep it on
        # the VPU/XLU: broadcast multiply + reduce over the feature axis.
        s = jnp.expand_dims(jnp.sum(q * k, axis=-1), 1)              # (B, 1, Lk)
    else:
        s = jnp.einsum("bqd,bkd->bqk", q, k,
                       preferred_element_type=jnp.float32)           # (B, Lq, Lk)

    # Numerically stable softmax over the key axis; reciprocal on the EUP slot.
    m = jnp.max(s, axis=-1, keepdims=True)
    e = jnp.exp(s - m)
    p = e * pl.reciprocal(jnp.sum(e, axis=-1, keepdims=True), approx=True)

    # dropout (eval mode) == identity.

    o = jnp.einsum("bqk,bkd->bqd", p, v,
                   preferred_element_type=jnp.float32)               # (B, Lq, Dv)
    o_ref[...] = o.astype(o_ref.dtype)


def sdpa_pallas(q, k, v, scale_factor=1.0, dropout_p=1.0, training=False):
    """Scaled-dot-product attention matching the PyTorch Model.forward."""
    B, Lq, D = q.shape
    Bk, Lk, Dk = k.shape
    Bv, Lkv, Dv = v.shape
    assert B == Bk == Bv and D == Dk and Lk == Lkv

    if training and dropout_p >= 1.0:
        # F.dropout(p=1, training=True) zeroes the whole tensor.
        return jnp.zeros((B, Lq, Dv), q.dtype)
    # TODO(synk): stochastic training-mode dropout (0 < p < 1) not implemented;
    # eval-mode (identity) semantics are used below.

    scale = 1.0 / float(scale_factor)

    if Lq == 1 and Lk == 1:
        # softmax over a single key == 1.0 exactly -> out == v bit-exactly.
        # NOTE: this bypasses the score math, so NaN/Inf in q/k/scale do not
        # propagate (they mathematically cancel in exact softmax anyway).
        return pl.pallas_call(
            _hbm_copy_kernel,
            out_shape=jax.ShapeDtypeStruct((B, Lq, Dv), v.dtype),
            in_specs=[pl.BlockSpec(memory_space=pl.ANY)],
            out_specs=pl.BlockSpec(memory_space=pl.ANY),
            scratch_shapes=[pltpu.SemaphoreType.DMA(())],
        )(v)

    # ---- General fused path ------------------------------------------------
    # Whole problem resident in VMEM (single ungridded block).  Guard footprint
    # so this never silently exceeds scoped VMEM (tightest: v5e 16 MiB default).
    # TODO(synk): for real attention sizes, tile over B with a 'parallel' grid
    # axis and lane-dense (multiple-of-128) trailing dims.
    f32_bytes = 4 * (B * Lq * D + B * Lk * D + B * Lk * Dv + B * Lq * Dv + B * Lq * Lk)
    assert f32_bytes * 4 < 16 * 1024 * 1024, (
        "general path keeps the whole problem in VMEM; problem too large -- "
        "add a batch grid")

    kernel = functools.partial(_sdpa_fused_kernel, scale=scale)
    return pl.pallas_call(
        kernel,
        out_shape=jax.ShapeDtypeStruct((B, Lq, Dv), q.dtype),
        in_specs=[
            pl.BlockSpec(memory_space=pltpu.MemorySpace.VMEM),
            pl.BlockSpec(memory_space=pltpu.MemorySpace.VMEM),
            pl.BlockSpec(memory_space=pltpu.MemorySpace.VMEM),
        ],
        out_specs=pl.BlockSpec(memory_space=pltpu.MemorySpace.VMEM),
        compiler_params=pltpu.CompilerParams(vmem_limit_bytes=32 * 1024 * 1024),
    )(q, k, v)


def _reference(q, k, v, scale_factor=1.0):
    scale = 1.0 / float(scale_factor)
    a = jnp.einsum("bqd,bkd->bqk", q, k, precision=lax.Precision.HIGHEST) * scale
    b = jax.nn.softmax(a, axis=-1)
    return jnp.einsum("bqk,bkd->bqd", b, v, precision=lax.Precision.HIGHEST)


if __name__ == "__main__":
    # Shapes from the PyTorch module: q/k/v = (d_model, 1, 32).
    d_model, seq, head_dim = 64, 1, 32

    kq, kk, kv = jax.random.split(jax.random.PRNGKey(0), 3)
    q = jax.random.normal(kq, (d_model, seq, head_dim), dtype=jnp.float32)
    k = jax.random.normal(kk, (d_model, seq, head_dim), dtype=jnp.float32)
    v = jax.random.normal(kv, (d_model, seq, head_dim), dtype=jnp.float32)

    scale_factor = 1.0
    dropout_p = 1.0

    out = jax.block_until_ready(sdpa_pallas(q, k, v, scale_factor, dropout_p))
    ref = _reference(q, k, v, scale_factor)
    assert out.shape == (d_model, seq, head_dim)
    assert jnp.allclose(out, ref, atol=1e-6, rtol=1e-6), "mismatch (Lq=Lk=1 DMA path)"

    # Validate the general fused path (Lq > 1, Lk > 1): exercises einsum/softmax.
    kq2, kk2, kv2 = jax.random.split(jax.random.PRNGKey(1), 3)
    q2 = jax.random.normal(kq2, (4, 8, 32), dtype=jnp.float32)
    k2 = jax.random.normal(kk2, (4, 16, 32), dtype=jnp.float32)
    v2 = jax.random.normal(kv2, (4, 16, 32), dtype=jnp.float32)
    out2 = jax.block_until_ready(sdpa_pallas(q2, k2, v2, 2.0, dropout_p))
    ref2 = _reference(q2, k2, v2, 2.0)
    assert out2.shape == (4, 8, 32)
    assert jnp.allclose(out2, ref2, atol=2e-3, rtol=2e-3), "mismatch (Lk>1 path)"

    # Validate the Lq == 1, Lk > 1 branch (VPU score formulation).
    kq3, kk3, kv3 = jax.random.split(jax.random.PRNGKey(2), 3)
    q3 = jax.random.normal(kq3, (4, 1, 32), dtype=jnp.float32)
    k3 = jax.random.normal(kk3, (4, 16, 32), dtype=jnp.float32)
    v3 = jax.random.normal(kv3, (4, 16, 32), dtype=jnp.float32)
    out3 = jax.block_until_ready(sdpa_pallas(q3, k3, v3, 0.5, dropout_p))
    ref3 = _reference(q3, k3, v3, 0.5)
    assert out3.shape == (4, 1, 32)
    assert jnp.allclose(out3, ref3, atol=2e-3, rtol=2e-3), "mismatch (Lq=1,Lk>1 path)"

    print("KERNEL_OK")
</pallas_src>

<mosaic_0001>
module attributes {stable_mosaic.version = 11 : i64} {
  func.func @_hbm_copy_kernel(%arg0: memref<64x1x32xf32, #tpu.memory_space<any>>, %arg1: memref<64x1x32xf32, #tpu.memory_space<any>>, %arg2: memref<!tpu.dma_semaphore, #tpu.memory_space<semaphore_mem>>) attributes {dimension_semantics = [], scalar_prefetch = 0 : i64, scratch_operands = 1 : i64, tpu.core_type = #tpu.core_type<tc>} {
    tpu.enqueue_dma source(%arg0 : memref<64x1x32xf32, #tpu.memory_space<any>>) target(%arg1 : memref<64x1x32xf32, #tpu.memory_space<any>>) target_semaphore(%arg2 : memref<!tpu.dma_semaphore, #tpu.memory_space<semaphore_mem>>)
    tpu.wait_dma2 semaphore(%arg2 : memref<!tpu.dma_semaphore, #tpu.memory_space<semaphore_mem>>) src(%arg0 : memref<64x1x32xf32, #tpu.memory_space<any>>) dst(%arg1 : memref<64x1x32xf32, #tpu.memory_space<any>>)
    return
  }
}

</mosaic_0001>

<bundles_post_ra>
// kernel: tpu_custom_call.1
= control target key start
LH: loop header
LB: loop body
LE: loop exit
PB: predicated region body
PF: predicated region fallthrough
CT: control target
= control target key end

     0   :  { %s141_s0 = inlined_call_operand.vmem [shape: f32[64,1,32], index: 0, kind: input, shape index: {}]   ;;  %s142_s1 = inlined_call_operand.vmem [shape: f32[64,1,32], index: 1, kind: output, shape index: {}]  }
   0x1   :  { %v38_v0 = vld [vmem:[%s141_s0] sm:$0xff]  ;;  %v40_v1 = vld [vmem:[%s141_s0 + $0x8] sm:$0xff]  ;;  %v42_v2 = vld [vmem:[%s141_s0 + $0x10] sm:$0xff] }
   0x2   :  { %39 = vst [vmem:[%s142_s1] sm:$0xff] %v38_v0  ;;  %41 = vst [vmem:[%s142_s1 + $0x8] sm:$0xff] %v40_v1  ;;  %v44_v3 = vld [vmem:[%s141_s0 + $0x18] sm:$0xff]  ;;  %v46_v4 = vld [vmem:[%s141_s0 + $0x20] sm:$0xff] }
   0x3   :  { %43 = vst [vmem:[%s142_s1 + $0x10] sm:$0xff] %v42_v2  ;;  %v48_v5 = vld [vmem:[%s141_s0 + $0x28] sm:$0xff]  ;;  %45 = vst [vmem:[%s142_s1 + $0x18] sm:$0xff] %v44_v3  ;;  %v50_v6 = vld [vmem:[%s141_s0 + $0x30] sm:$0xff] }
   0x4   :  { %47 = vst [vmem:[%s142_s1 + $0x20] sm:$0xff] %v46_v4  ;;  %49 = vst [vmem:[%s142_s1 + $0x28] sm:$0xff] %v48_v5  ;;  %v52_v7 = vld [vmem:[%s141_s0 + $0x38] sm:$0xff] }
   0x5   :  { %51 = vst [vmem:[%s142_s1 + $0x30] sm:$0xff] %v50_v6  ;;  %53 = vst [vmem:[%s142_s1 + $0x38] sm:$0xff] %v52_v7 }
   0x6   :  { %61 = vsyncadd [#allocation2], 1024 }
   0x7   :  { %81 = dma.done.wait [#allocation2], 1024 }
   0x8   :  { %82 = vsyncadd [#allocation2], 4294966272 }
   0x9   :  { %66 = vsyncmov [#allocation2] }
   0xc   :  { %s67_s9 = vpop.sfrf %66 }
   0xd   :  { %p80_p0 = scmp.ne.s32.totalorder %s67_s9, 0 }
   0xf   :  { %71 = shalt.err (%p80_p0)  }

</bundles_post_ra>
